<compile_context>
chip_gen: v6e
topology: v6e:2x2x1
jax: 0.10.0
libtpu: 0.0.40
codegen_flags: <defaults>
</compile_context>

<pallas_src>
import jax
import jax.numpy as jnp
from jax import lax
from jax.experimental import pallas as pl
from jax.experimental.pallas import tpu as pltpu


def _round_up(x, m):
    return ((x + m - 1) // m) * m


def _make_rnn_block_kernel(T, TB, Bp):
    """Kernel closure over static T (true seq len), TB (time block), Bp (padded batch)."""

    def kernel(preact_ref, h0_ref, w_hhT_ref, w_outT_ref, b_out_ref,
               out_ref, h_final_ref, h_seq):
        b = pl.program_id(0)

        # Initialize the resident hidden-state carry from h0 on the first block.
        @pl.when(b == 0)
        def _():
            h_final_ref[...] = h0_ref[...]

        w_hhT = w_hhT_ref[...]            # (Lp, Lp) stays in VMEM/vregs for the block

        def step(i, h):
            off = pl.multiple_of(i * Bp, Bp)
            pre = preact_ref[pl.ds(off, Bp), :]            # x_t @ W_ih^T + b (precomputed)
            h_new = jnp.tanh(
                pre + jnp.dot(h.astype(w_hhT.dtype), w_hhT,
                              preferred_element_type=jnp.float32))
            h_seq[pl.ds(off, Bp), :] = h_new               # stash for batched readout
            # Freeze the carry on padded (t >= T) steps so h_final is exact.
            valid = (b * TB + i) < T
            return jnp.where(valid, h_new, h)

        h_last = lax.fori_loop(0, TB, step, h_final_ref[...], unroll=True)
        h_final_ref[...] = h_last

        # Batched readout over the whole time block: (TB*Bp, Lp) @ (Lp, Op).
        out = (jnp.dot(h_seq[...].astype(w_outT_ref.dtype), w_outT_ref[...],
                       preferred_element_type=jnp.float32)
               + b_out_ref[...].astype(jnp.float32))
        out_ref[...] = out.astype(out_ref.dtype)

    return kernel


def vanilla_rnn_sequence(xs, h0, params, time_block=32):
    """Run the Vanilla RNN over a whole sequence in one fused pallas_call.

    xs: [T, B, input_size], h0: [B, latent] or None (zeros, like PyTorch).
    Returns (outputs [T, B, output_size], final hidden [B, latent] in f32).
    """
    w_ih, w_hh, b_ih, b_hh, w_out, b_out = params
    T, B, I = xs.shape
    L = w_hh.shape[0]
    O = w_out.shape[0]

    if h0 is None:
        h0 = jnp.zeros((B, L), jnp.float32)

    # Padded, MXU/store-friendly shapes.
    Bp = _round_up(max(B, 1), 8)
    Lp = _round_up(max(L, 1), 128)
    Op = _round_up(max(O, 1), 128)

    # Time blocking: amortize per-grid-step overhead over TB steps.
    TB = max(1, min(int(time_block), T))
    Tp = _round_up(T, TB)
    num_blocks = Tp // TB

    # ---- Hoisted, non-recurrent input projection (one big matmul, f32) ----
    xs_f = xs.reshape(T * B, I).astype(jnp.float32)
    preact = xs_f @ w_ih.T.astype(jnp.float32) + (b_ih + b_hh).astype(jnp.float32)
    preact_p = (jnp.zeros((Tp, Bp, Lp), jnp.float32)
                .at[:T, :B, :L].set(preact.reshape(T, B, L))
                .reshape(Tp * Bp, Lp))

    # ---- Parameter prep: pre-transposed, zero-padded, done once ----
    w_hhT = jnp.zeros((Lp, Lp), w_hh.dtype).at[:L, :L].set(w_hh.T)
    w_outT = jnp.zeros((Lp, Op), w_out.dtype).at[:L, :O].set(w_out.T)
    b_o = jnp.zeros((1, Op), jnp.float32).at[0, :O].set(b_out.astype(jnp.float32))
    h0_p = jnp.zeros((Bp, Lp), jnp.float32).at[:B, :L].set(h0.astype(jnp.float32))

    kernel = _make_rnn_block_kernel(T, TB, Bp)

    out_shapes = (
        jax.ShapeDtypeStruct((Tp * Bp, Op), xs.dtype),   # per-step outputs (flattened T*B rows)
        jax.ShapeDtypeStruct((Bp, Lp), jnp.float32),     # final hidden (f32 carry)
    )

    outs_flat, h_final_p = pl.pallas_call(
        kernel,
        out_shape=out_shapes,
        grid_spec=pltpu.PrefetchScalarGridSpec(
            num_scalar_prefetch=0,
            grid=(num_blocks,),
            in_specs=[
                pl.BlockSpec((TB * Bp, Lp), lambda b: (b, 0)),  # pre-activations (streamed)
                pl.BlockSpec((Bp, Lp), lambda b: (0, 0)),       # h0 (resident)
                pl.BlockSpec((Lp, Lp), lambda b: (0, 0)),       # W_hh^T (resident)
                pl.BlockSpec((Lp, Op), lambda b: (0, 0)),       # W_out^T (resident)
                pl.BlockSpec((1, Op), lambda b: (0, 0)),        # b_out (resident)
            ],
            out_specs=(
                pl.BlockSpec((TB * Bp, Op), lambda b: (b, 0)),  # outputs for this time block
                pl.BlockSpec((Bp, Lp), lambda b: (0, 0)),       # hidden carry / final hidden
            ),
            scratch_shapes=[pltpu.VMEM((TB * Bp, Lp), jnp.float32)],  # h stash for readout
        ),
        compiler_params=pltpu.CompilerParams(
            dimension_semantics=("arbitrary",),   # time axis carries state
        ),
    )(preact_p, h0_p, w_hhT, w_outT, b_o)

    outs = outs_flat.reshape(Tp, Bp, Op)[:T, :B, :O]
    return outs, h_final_p[:B, :L]


def vanilla_rnn_forward(x, hidden, params):
    """PyTorch Vanilla_RNN.forward semantics: one step, returns (output, hidden)."""
    outs, h_new = vanilla_rnn_sequence(x[None], hidden, params, time_block=1)
    return outs[0], h_new


def init_params(key, input_size, latent_size, output_size, dtype=jnp.float32):
    """Deterministic init mimicking PyTorch RNNCell/Linear uniform(-k, k)."""
    k_cell = 1.0 / jnp.sqrt(latent_size)
    k_lin = 1.0 / jnp.sqrt(latent_size)
    ks = jax.random.split(key, 6)
    w_ih = jax.random.uniform(ks[0], (latent_size, input_size), dtype, -k_cell, k_cell)
    w_hh = jax.random.uniform(ks[1], (latent_size, latent_size), dtype, -k_cell, k_cell)
    b_ih = jax.random.uniform(ks[2], (latent_size,), dtype, -k_cell, k_cell)
    b_hh = jax.random.uniform(ks[3], (latent_size,), dtype, -k_cell, k_cell)
    w_out = jax.random.uniform(ks[4], (output_size, latent_size), dtype, -k_lin, k_lin)
    b_out = jax.random.uniform(ks[5], (output_size,), dtype, -k_lin, k_lin)
    return (w_ih, w_hh, b_ih, b_hh, w_out, b_out)


def reference_step(x, h, params):
    w_ih, w_hh, b_ih, b_hh, w_out, b_out = params
    h_new = jnp.tanh(x @ w_ih.T + b_ih + h @ w_hh.T + b_hh)
    out = h_new @ w_out.T + b_out
    return out, h_new


if __name__ == "__main__":
    # Small shapes implied by the module: (batch, input_size) inputs, latent hidden.
    batch, input_size, latent_size, output_size = 2, 16, 32, 8
    seq_len = 8

    key = jax.random.PRNGKey(0)
    k_x, k_h, k_p, k_seq, k_long = jax.random.split(key, 5)
    x = jax.random.normal(k_x, (batch, input_size), jnp.float32)
    h0 = jax.random.normal(k_h, (batch, latent_size), jnp.float32)
    params = init_params(k_p, input_size, latent_size, output_size)

    # --- single-step forward (module semantics) ---
    out, h_new = jax.block_until_ready(vanilla_rnn_forward(x, h0, params))
    ref_out, ref_h = reference_step(x, h0, params)
    assert jnp.allclose(out, ref_out, atol=1e-5, rtol=1e-5)
    assert jnp.allclose(h_new, ref_h, atol=1e-5, rtol=1e-5)

    # hidden=None path (PyTorch RNNCell uses zeros).
    out0, h0_new = jax.block_until_ready(vanilla_rnn_forward(x, None, params))
    ref_out0, ref_h0 = reference_step(x, jnp.zeros((batch, latent_size)), params)
    assert jnp.allclose(out0, ref_out0, atol=1e-5, rtol=1e-5)
    assert jnp.allclose(h0_new, ref_h0, atol=1e-5, rtol=1e-5)

    # --- fused multi-step sequence (single time block) ---
    xs = jax.random.normal(k_seq, (seq_len, batch, input_size), jnp.float32)
    outs, h_final = jax.block_until_ready(vanilla_rnn_sequence(xs, h0, params))
    h_ref = h0
    for t in range(seq_len):
        o_ref, h_ref = reference_step(xs[t], h_ref, params)
        assert jnp.allclose(outs[t], o_ref, atol=1e-4, rtol=1e-4)
    assert jnp.allclose(h_final, h_ref, atol=1e-4, rtol=1e-4)

    # --- longer sequence: multiple time blocks + remainder masking path ---
    long_T = 40   # with time_block=32 -> 2 grid blocks, 24 padded (masked) steps
    xs_long = jax.random.normal(k_long, (long_T, batch, input_size), jnp.float32)
    outs_l, h_final_l = jax.block_until_ready(
        vanilla_rnn_sequence(xs_long, h0, params, time_block=32))
    h_ref = h0
    for t in range(long_T):
        o_ref, h_ref = reference_step(xs_long[t], h_ref, params)
        assert jnp.allclose(outs_l[t], o_ref, atol=1e-4, rtol=1e-4)
    assert jnp.allclose(h_final_l, h_ref, atol=1e-4, rtol=1e-4)

    print("KERNEL_OK")
</pallas_src>

<mosaic_0001>
module attributes {stable_mosaic.version = 11 : i64} {
  func.func @kernel(%arg0: i32, %arg1: memref<8x128xf32, #tpu.memory_space<vmem>>, %arg2: memref<8x128xf32, #tpu.memory_space<vmem>>, %arg3: memref<128x128xf32, #tpu.memory_space<vmem>>, %arg4: memref<128x128xf32, #tpu.memory_space<vmem>>, %arg5: memref<1x128xf32, #tpu.memory_space<vmem>>, %arg6: memref<8x128xf32, #tpu.memory_space<vmem>>, %arg7: memref<8x128xf32, #tpu.memory_space<vmem>>, %arg8: memref<8x128xf32, #tpu.memory_space<vmem>>) attributes {dimension_semantics = [#tpu.dimension_semantics<arbitrary>], iteration_bounds = array<i64: 1>, scalar_prefetch = 0 : i64, scratch_operands = 1 : i64, tpu.core_type = #tpu.core_type<tc>, window_params = [{transform_indices = @transform_0, window_bounds = array<i64: 8, 128>}, {pipeline_mode = #tpu.pipeline_mode<synchronous>, transform_indices = @transform_1, window_bounds = array<i64: 8, 128>}, {pipeline_mode = #tpu.pipeline_mode<synchronous>, transform_indices = @transform_2, window_bounds = array<i64: 128, 128>}, {pipeline_mode = #tpu.pipeline_mode<synchronous>, transform_indices = @transform_3, window_bounds = array<i64: 128, 128>}, {pipeline_mode = #tpu.pipeline_mode<synchronous>, transform_indices = @transform_4, window_bounds = array<i64: 1, 128>}, {transform_indices = @transform_5, window_bounds = array<i64: 8, 128>}, {pipeline_mode = #tpu.pipeline_mode<synchronous>, transform_indices = @transform_6, window_bounds = array<i64: 8, 128>}]} {
    %c0_i32 = arith.constant 0 : i32
    %0 = arith.cmpi eq, %arg0, %c0_i32 : i32
    %1 = arith.extui %0 : i1 to i32
    %c0_i32_0 = arith.constant 0 : i32
    %2 = arith.cmpi ne, %1, %c0_i32_0 : i32
    scf.if %2 {
      %c0_20 = arith.constant 0 : index
      %c0_21 = arith.constant 0 : index
      %26 = vector.load %arg2[%c0_20, %c0_21] : memref<8x128xf32, #tpu.memory_space<vmem>>, vector<8x128xf32>
      %c0_22 = arith.constant 0 : index
      %c0_23 = arith.constant 0 : index
      %27 = vector.load %arg7[%c0_22, %c0_23] : memref<8x128xf32, #tpu.memory_space<vmem>>, vector<8x128xf32>
      tpu.vector_store %arg7[%c0_22, %c0_23], %26 {strides = array<i32>} : memref<8x128xf32, #tpu.memory_space<vmem>>, vector<8x128xf32>,
    } else {
    }
    %c0 = arith.constant 0 : index
    %c0_1 = arith.constant 0 : index
    %3 = vector.load %arg3[%c0, %c0_1] : memref<128x128xf32, #tpu.memory_space<vmem>>, vector<128x128xf32>
    %c0_2 = arith.constant 0 : index
    %c0_3 = arith.constant 0 : index
    %4 = vector.load %arg7[%c0_2, %c0_3] : memref<8x128xf32, #tpu.memory_space<vmem>>, vector<8x128xf32>
    %c0_i32_4 = arith.constant 0 : i32
    %c8_i32 = arith.constant 8 : i32
    %5 = arith.muli %c0_i32_4, %c8_i32 : i32
    %6 = tpu.assume_multiple %5, 8 : i32
    %7 = arith.index_cast %6 : i32 to index
    %c0_5 = arith.constant 0 : index
    %8 = vector.load %arg1[%7, %c0_5] : memref<8x128xf32, #tpu.memory_space<vmem>>, vector<8x128xf32>
    %cst = arith.constant dense<0.000000e+00> : vector<8x128xf32>
    %9 = tpu.matmul %4, %3, %cst {dimension_numbers = #tpu.dot_dimension_numbers<[1], [0], [0], [1], [0, 0, 1, 1], [], []>} : vector<8x128xf32>, vector<128x128xf32>, vector<8x128xf32> -> vector<8x128xf32>
    %10 = arith.addf %8, %9 : vector<8x128xf32>
    %11 = math.tanh %10 : vector<8x128xf32>
    %12 = arith.index_cast %6 : i32 to index
    %c0_6 = arith.constant 0 : index
    %13 = vector.load %arg8[%12, %c0_6] : memref<8x128xf32, #tpu.memory_space<vmem>>, vector<8x128xf32>
    tpu.vector_store %arg8[%12, %c0_6], %11 {strides = array<i32>} : memref<8x128xf32, #tpu.memory_space<vmem>>, vector<8x128xf32>,
    %c1_i32 = arith.constant 1 : i32
    %14 = arith.muli %arg0, %c1_i32 : i32
    %15 = arith.addi %14, %c0_i32_4 : i32
    %c1_i32_7 = arith.constant 1 : i32
    %16 = arith.cmpi slt, %15, %c1_i32_7 : i32
    %17 = arith.select %16, %11, %4 : vector<8x128xf32>
    %c1_i32_8 = arith.constant 1 : i32
    %c0_9 = arith.constant 0 : index
    %c0_10 = arith.constant 0 : index
    %18 = vector.load %arg7[%c0_9, %c0_10] : memref<8x128xf32, #tpu.memory_space<vmem>>, vector<8x128xf32>
    tpu.vector_store %arg7[%c0_9, %c0_10], %17 {strides = array<i32>} : memref<8x128xf32, #tpu.memory_space<vmem>>, vector<8x128xf32>,
    %c0_11 = arith.constant 0 : index
    %c0_12 = arith.constant 0 : index
    %19 = vector.load %arg8[%c0_11, %c0_12] : memref<8x128xf32, #tpu.memory_space<vmem>>, vector<8x128xf32>
    %c0_13 = arith.constant 0 : index
    %c0_14 = arith.constant 0 : index
    %20 = vector.load %arg4[%c0_13, %c0_14] : memref<128x128xf32, #tpu.memory_space<vmem>>, vector<128x128xf32>
    %cst_15 = arith.constant dense<0.000000e+00> : vector<8x128xf32>
    %21 = tpu.matmul %19, %20, %cst_15 {dimension_numbers = #tpu.dot_dimension_numbers<[1], [0], [0], [1], [0, 0, 1, 1], [], []>} : vector<8x128xf32>, vector<128x128xf32>, vector<8x128xf32> -> vector<8x128xf32>
    %c0_16 = arith.constant 0 : index
    %c0_17 = arith.constant 0 : index
    %22 = vector.load %arg5[%c0_16, %c0_17] : memref<1x128xf32, #tpu.memory_space<vmem>>, vector<1x128xf32>
    %23 = vector.broadcast %22 : vector<1x128xf32> to vector<8x128xf32>
    %24 = arith.addf %21, %23 : vector<8x128xf32>
    %c0_18 = arith.constant 0 : index
    %c0_19 = arith.constant 0 : index
    %25 = vector.load %arg6[%c0_18, %c0_19] : memref<8x128xf32, #tpu.memory_space<vmem>>, vector<8x128xf32>
    tpu.vector_store %arg6[%c0_18, %c0_19], %24 {strides = array<i32>} : memref<8x128xf32, #tpu.memory_space<vmem>>, vector<8x128xf32>,
    return
  }
  func.func @transform_0(%arg0: i32) -> (i32, i32) {
    %c0_i32 = arith.constant 0 : i32
    %c0_i32_0 = arith.constant 0 : i32
    return %arg0, %c0_i32 : i32, i32
  }
  func.func @transform_1(%arg0: i32) -> (i32, i32) {
    %c0_i32 = arith.constant 0 : i32
    %c0_i32_0 = arith.constant 0 : i32
    %c0_i32_1 = arith.constant 0 : i32
    return %c0_i32, %c0_i32_0 : i32, i32
  }
  func.func @transform_2(%arg0: i32) -> (i32, i32) {
    %c0_i32 = arith.constant 0 : i32
    %c0_i32_0 = arith.constant 0 : i32
    %c0_i32_1 = arith.constant 0 : i32
    return %c0_i32, %c0_i32_0 : i32, i32
  }
  func.func @transform_3(%arg0: i32) -> (i32, i32) {
    %c0_i32 = arith.constant 0 : i32
    %c0_i32_0 = arith.constant 0 : i32
    %c0_i32_1 = arith.constant 0 : i32
    return %c0_i32, %c0_i32_0 : i32, i32
  }
  func.func @transform_4(%arg0: i32) -> (i32, i32) {
    %c0_i32 = arith.constant 0 : i32
    %c0_i32_0 = arith.constant 0 : i32
    %c0_i32_1 = arith.constant 0 : i32
    return %c0_i32, %c0_i32_0 : i32, i32
  }
  func.func @transform_5(%arg0: i32) -> (i32, i32) {
    %c0_i32 = arith.constant 0 : i32
    %c0_i32_0 = arith.constant 0 : i32
    return %arg0, %c0_i32 : i32, i32
  }
  func.func @transform_6(%arg0: i32) -> (i32, i32) {
    %c0_i32 = arith.constant 0 : i32
    %c0_i32_0 = arith.constant 0 : i32
    %c0_i32_1 = arith.constant 0 : i32
    return %c0_i32, %c0_i32_0 : i32, i32
  }
}

</mosaic_0001>

<bundles_post_ra>
// kernel: tpu_custom_call.1
= control target key start
LH: loop header
LB: loop body
LE: loop exit
PB: predicated region body
PF: predicated region fallthrough
CT: control target
= control target key end

     0   :  { %12 = vsyncpa [#allocation4], 0  ;;  %s651_s0 = inlined_call_operand.hbm [shape: f32[8,128], index: 0, kind: input, shape index: {}]   ;;  %s652_s1 = inlined_call_operand.hbm [shape: f32[8,128], index: 1, kind: input, shape index: {}]   ;;  %s653_s2 = inlined_call_operand.hbm [shape: f32[128,128], index: 2, kind: input, shape index: {}]   ;;  %s654_s3 = inlined_call_operand.hbm [shape: f32[128,128], index: 3, kind: input, shape index: {}]   ;;  %s655_s4 = inlined_call_operand.vmem [shape: f32[1,128], index: 4, kind: input, shape index: {}]   ;;  %s656_s5 = inlined_call_operand.hbm [shape: f32[8,128], index: 5, kind: output, shape index: {0}]   ;;  %s657_s6 = inlined_call_operand.hbm [shape: f32[8,128], index: 6, kind: output, shape index: {1}]  }
   0x1   :  { %13 = vsyncpa [#allocation7], 0 }
   0x2   :  { %14 = vsyncpa [#allocation10], 0 }
   0x3   :  { %15 = vsyncpa [#allocation5], 0 }
   0x4   :  { %16 = vsyncpa [#allocation13], 0  ;;  %s551_s21 = smov [#allocation6]   ;;  %s552_s23 = smov [#allocation3]  }
   0x5   :  { %s33_s22 = sshll.u32 %s551_s21, 4  ;;  %s23_s24 = sshll.u32 %s552_s23, 4  ;;  %s34_s22 = int_to_ptr.vmem [resolvable:$true] %s33_s22  ;;  %s24_s24 = int_to_ptr.vmem [resolvable:$true] %s23_s24 }
   0x6   :  { %s429_s25 = scalar_lea.vmem %s34_s22, 128  ;;  %p434_p1 = scmp.lt.s32.totalorder %s34_s22, %s34_s22 }
   0x7   :  { %p430_p0 = scmp.ne.s32.totalorder %s34_s22, %s429_s25  ;;  %p435_p2 = scmp.lt.s32.totalorder %s429_s25, %s429_s25 }
   0x9   :  { %p436_p3 = por %p435_p2, %p434_p1 }
   0xb   :  { %p437_p4 = pnand %p436_p3, %p430_p0 }
   0xd   :  { %440 = shalt.err (!%p437_p4)
}
   0xe   :  { %36 = dma.hbm_to_vmem [thread:$0]  %s652_s1, 128, %s34_s22, [#allocation7]  }
   0xf   :  { %s449_s28 = scalar_lea.vmem %s24_s24, 128  ;;  %p454_p6 = scmp.lt.s32.totalorder %s24_s24, %s24_s24 }
  0x10   :  { %p450_p5 = scmp.ne.s32.totalorder %s24_s24, %s449_s28  ;;  %p455_p7 = scmp.lt.s32.totalorder %s449_s28, %s449_s28 }
  0x12   :  { %p456_p8 = por %p455_p7, %p454_p6 }
  0x14   :  { %p457_p9 = pnand %p456_p8, %p450_p5 }
  0x16   :  { %460 = shalt.err (!%p457_p9)
}
  0x17   :  { %26 = dma.hbm_to_vmem [thread:$0]  %s651_s0, 128, %s24_s24, [#allocation4]  }
  0x18   :  { %s553_s7 = smov [#allocation8]  }
  0x19   :  { %s42_s8 = sshll.u32 %s553_s7, 4  ;;  %s43_s8 = int_to_ptr.vmem [resolvable:$true] %s42_s8 }
  0x1a   :  { %s469_s9 = scalar_lea.vmem %s43_s8, 2048  ;;  %p474_p11 = scmp.lt.s32.totalorder %s43_s8, %s43_s8 }
  0x1b   :  { %p470_p10 = scmp.ne.s32.totalorder %s43_s8, %s469_s9  ;;  %p475_p12 = scmp.lt.s32.totalorder %s469_s9, %s469_s9 }
  0x1d   :  { %p476_p13 = por %p475_p12, %p474_p11 }
  0x1f   :  { %p477_p0 = pnand %p476_p13, %p470_p10 }
  0x21   :  { %480 = shalt.err (!%p477_p0)
}
  0x22   :  { %s554_s1 = smov 128   ;;  %s555_s10 = smov 8  }
  0x23   :  { %48 = dma.hbm_to_vmem [thread:$0]  %s653_s2, 2048, %s43_s8, [#allocation7], %s554_s1, %s554_s1, %s555_s10  }
  0x24   :  { %s556_s13 = smov [#allocation9]  }
  0x25   :  { %s54_s14 = sshll.u32 %s556_s13, 4  ;;  %s55_s14 = int_to_ptr.vmem [resolvable:$true] %s54_s14 }
  0x26   :  { %s489_s0 = scalar_lea.vmem %s55_s14, 2048  ;;  %p494_p2 = scmp.lt.s32.totalorder %s55_s14, %s55_s14 }
  0x27   :  { %p490_p1 = scmp.ne.s32.totalorder %s55_s14, %s489_s0  ;;  %p495_p3 = scmp.lt.s32.totalorder %s489_s0, %s489_s0 }
  0x29   :  { %p496_p4 = por %p495_p3, %p494_p2 }
  0x2b   :  { %p497_p5 = pnand %p496_p4, %p490_p1 }
  0x2d   :  { %500 = shalt.err (!%p497_p5)
}
  0x2e   :  { %60 = dma.hbm_to_vmem [thread:$0]  %s654_s3, 2048, %s55_s14, [#allocation10], %s554_s1, %s554_s1, %s555_s10  }
  0x2f   :  { %541 = dma.done.wait [#allocation4], 128  }
  0x30   :  { %542 = vsyncadd [#allocation4], 4294967168 }
  0x31   :  { %543 = dma.done.wait [#allocation7], 2176  }
  0x32   :  { %544 = vsyncadd [#allocation7], 4294965120 }
  0x33   :  { %545 = dma.done.wait [#allocation10], 2048  }
  0x34   :  { %546 = vsyncadd [#allocation10], 4294965248  ;;  %v557_v0 = vmov 0.0   ;;  %vm558_vm0 = vmmov 0   ;;  %v96_v1 = vld [vmem:[#allocation8 + $0x78] sm:$0xff]  ;;  %v95_v2 = vld [vmem:[#allocation8 + $0x70] sm:$0xff] }
  0x35   :  { %339 = vmatprep.subr.mxu0 %v557_v0  ;;  %371 = vmatprep.mubr.msk.f32.mxu0 %vm558_vm0, %v557_v0  ;;  %v94_v3 = vld [vmem:[#allocation8 + $0x68] sm:$0xff]  ;;  %v93_v4 = vld [vmem:[#allocation8 + $0x60] sm:$0xff]  ;;  %v194_v5 = vld [vmem:[#allocation9 + $0x78] sm:$0xff]  ;;  %s559_s2 = smov [#allocation12]  }
  0x36   :  { %374 = vmatprep.subr.mxu1 %v557_v0  ;;  %406 = vmatprep.mubr.msk.f32.mxu1 %vm558_vm0, %v557_v0  ;;  %v92_v6 = vld [vmem:[#allocation8 + $0x58] sm:$0xff]  ;;  %v193_v7 = vld [vmem:[#allocation9 + $0x70] sm:$0xff]  ;;  %v192_v8 = vld [vmem:[#allocation9 + $0x68] sm:$0xff]  ;;  %s289_s3 = sshll.u32 %s559_s2, 4  ;;  %s290_s3 = int_to_ptr.vmem [resolvable:$true] %s289_s3 }
  0x37   :  { %340 = vmatpush3.msra.mxu0 %v96_v1  ;;  %375 = vmatpush3.msra.mxu1 %v194_v5  ;;  %v91_v9 = vld [vmem:[#allocation8 + $0x50] sm:$0xff]  ;;  %v191_v10 = vld [vmem:[#allocation9 + $0x60] sm:$0xff]  ;;  %v90_v11 = vld [vmem:[#allocation8 + $0x48] sm:$0xff]  ;;  %s501_s17 = scalar_lea.vmem %s290_s3, 128  ;;  %p506_p7 = scmp.lt.s32.totalorder %s290_s3, %s290_s3 }
  0x38   :  { %341 = vmatprep.subr.mxu0 %v557_v0  ;;  %376 = vmatprep.subr.mxu1 %v557_v0  ;;  %v190_v12 = vld [vmem:[#allocation9 + $0x58] sm:$0xff]  ;;  %v89_v13 = vld [vmem:[#allocation8 + $0x40] sm:$0xff]  ;;  %v189_v14 = vld [vmem:[#allocation9 + $0x50] sm:$0xff]  ;;  %p502_p6 = scmp.ne.s32.totalorder %s290_s3, %s501_s17  ;;  %p507_p8 = scmp.lt.s32.totalorder %s501_s17, %s501_s17 }
  0x39   :  { %342 = vmatpush3.msra.mxu0 %v95_v2  ;;  %377 = vmatpush3.msra.mxu1 %v193_v7  ;;  %v88_v15 = vld [vmem:[#allocation8 + $0x38] sm:$0xff]  ;;  %v188_v16 = vld [vmem:[#allocation9 + $0x48] sm:$0xff]  ;;  %v87_v17 = vld [vmem:[#allocation8 + $0x30] sm:$0xff] }
  0x3a   :  { %343 = vmatprep.subr.mxu0 %v557_v0  ;;  %378 = vmatprep.subr.mxu1 %v557_v0  ;;  %v86_v18 = vld [vmem:[#allocation8 + $0x28] sm:$0xff]  ;;  %v85_v19 = vld [vmem:[#allocation8 + $0x20] sm:$0xff]  ;;  %v84_v20 = vld [vmem:[#allocation8 + $0x18] sm:$0xff]  ;;  %p508_p9 = por %p507_p8, %p506_p7 }
  0x3b   :  { %344 = vmatpush3.msra.mxu0 %v94_v3  ;;  %379 = vmatpush3.msra.mxu1 %v192_v8  ;;  %v83_v21 = vld [vmem:[#allocation8 + $0x10] sm:$0xff]  ;;  %v82_v22 = vld [vmem:[#allocation8 + $0x8] sm:$0xff]  ;;  %v81_v23 = vld [vmem:[#allocation8] sm:$0xff] }
  0x3c   :  { %345 = vmatprep.subr.mxu0 %v557_v0  ;;  %380 = vmatprep.subr.mxu1 %v557_v0  ;;  %v79_v24 = vld [vmem:[#allocation6] sm:$0xff]  ;;  %v187_v25 = vld [vmem:[#allocation9 + $0x40] sm:$0xff]  ;;  %v185_v27 = vld [vmem:[#allocation9 + $0x30] sm:$0xff]  ;;  %p509_p10 = pnand %p508_p9, %p502_p6 }
  0x3d   :  { %346 = vmatpush3.msra.mxu0 %v93_v4  ;;  %381 = vmatpush3.msra.mxu1 %v191_v10  ;;  %v186_v26 = vld [vmem:[#allocation9 + $0x38] sm:$0xff]  ;;  %v184_v28 = vld [vmem:[#allocation9 + $0x28] sm:$0xff]  ;;  %v183_v29 = vld [vmem:[#allocation9 + $0x20] sm:$0xff] }
  0x3e   :  { %347 = vmatprep.subr.mxu0 %v557_v0  ;;  %382 = vmatprep.subr.mxu1 %v557_v0  ;;  %v182_v30 = vld [vmem:[#allocation9 + $0x18] sm:$0xff]  ;;  %v181_v31 = vld [vmem:[#allocation9 + $0x10] sm:$0xff]  ;;  %v180_v32 = vld [vmem:[#allocation9 + $0x8] sm:$0xff] }
  0x3f   :  { %348 = vmatpush3.msra.mxu0 %v92_v6  ;;  %383 = vmatpush3.msra.mxu1 %v190_v12  ;;  %v179_v33 = vld [vmem:[#allocation9] sm:$0xff]  ;;  %v98_v34 = vld [vmem:[#allocation3] sm:$0xff] }
  0x40   :  { %349 = vmatprep.subr.mxu0 %v557_v0  ;;  %384 = vmatprep.subr.mxu1 %v557_v0 }
  0x41   :  { %350 = vmatpush3.msra.mxu0 %v91_v9  ;;  %385 = vmatpush3.msra.mxu1 %v189_v14 }
  0x42   :  { %351 = vmatprep.subr.mxu0 %v557_v0  ;;  %386 = vmatprep.subr.mxu1 %v557_v0 }
  0x43   :  { %352 = vmatpush3.msra.mxu0 %v90_v11  ;;  %387 = vmatpush3.msra.mxu1 %v188_v16 }
  0x44   :  { %353 = vmatprep.subr.mxu0 %v557_v0  ;;  %388 = vmatprep.subr.mxu1 %v557_v0 }
  0x45   :  { %354 = vmatpush3.msra.mxu0 %v89_v13  ;;  %389 = vmatpush3.msra.mxu1 %v187_v25 }
  0x46   :  { %355 = vmatprep.subr.mxu0 %v557_v0  ;;  %390 = vmatprep.subr.mxu1 %v557_v0 }
  0x47   :  { %356 = vmatpush3.msra.mxu0 %v88_v15  ;;  %391 = vmatpush3.msra.mxu1 %v186_v26 }
  0x48   :  { %357 = vmatprep.subr.mxu0 %v557_v0  ;;  %392 = vmatprep.subr.mxu1 %v557_v0 }
  0x49   :  { %358 = vmatpush3.msra.mxu0 %v87_v17  ;;  %393 = vmatpush3.msra.mxu1 %v185_v27 }
  0x4a   :  { %359 = vmatprep.subr.mxu0 %v557_v0  ;;  %394 = vmatprep.subr.mxu1 %v557_v0 }
  0x4b   :  { %360 = vmatpush3.msra.mxu0 %v86_v18  ;;  %395 = vmatpush3.msra.mxu1 %v184_v28 }
  0x4c   :  { %361 = vmatprep.subr.mxu0 %v557_v0  ;;  %396 = vmatprep.subr.mxu1 %v557_v0 }
  0x4d   :  { %362 = vmatpush3.msra.mxu0 %v85_v19  ;;  %397 = vmatpush3.msra.mxu1 %v183_v29 }
  0x4e   :  { %363 = vmatprep.subr.mxu0 %v557_v0  ;;  %398 = vmatprep.subr.mxu1 %v557_v0 }
  0x4f   :  { %364 = vmatpush3.msra.mxu0 %v84_v20  ;;  %399 = vmatpush3.msra.mxu1 %v182_v30 }
  0x50   :  { %365 = vmatprep.subr.mxu0 %v557_v0  ;;  %400 = vmatprep.subr.mxu1 %v557_v0 }
  0x51   :  { %366 = vmatpush3.msra.mxu0 %v83_v21  ;;  %401 = vmatpush3.msra.mxu1 %v181_v31 }
  0x52   :  { %367 = vmatprep.subr.mxu0 %v557_v0  ;;  %402 = vmatprep.subr.mxu1 %v557_v0 }
  0x53   :  { %368 = vmatpush3.msra.mxu0 %v82_v22  ;;  %403 = vmatpush3.msra.mxu1 %v180_v32 }
  0x54   :  { %369 = vmatprep.subr.mxu0 %v557_v0  ;;  %404 = vmatprep.subr.mxu1 %v557_v0 }
  0x55   :  { %370 = vmatpush3.msra.mxu0 %v81_v23  ;;  %405 = vmatpush3.msra.mxu1 %v179_v33 }
  0x56   :  { %372 = vmatmul.mubr.f32.vlgmr.msra.gmra.mxu0 %v79_v24 }
 0x116   :  { %v165_v35 = vpop.f32.mrf.mxu0 }
 0x117   :  { %v169_v36 = vadd.f32 %v165_v35, %v98_v34 }
 0x118   :  { %v373_v37 = vpop.f32.mrf.mxu0 }
 0x119   :  { %419 = vtanh.f32 %v169_v36 }
 0x126   :  { %v420_v38 = vpop.eup %419 }
 0x127   :  { %177 = vst [vmem:[#allocation12] sm:$0xff] %v420_v38  ;;  %407 = vmatmul.mubr.f32.vlgmr.msra.gmra.mxu1 %v420_v38 }
 0x128   :  { %512 = shalt.err (!%p509_p10)
}
 0x129   :  { %292 = dma.vmem_to_hbm [thread:$0]  %s290_s3, 128, %s657_s6, [#allocation13]   ;;  %v304_v39 = vld [vmem:[%s655_s4] ss:$0 sm:$0xff] }
 0x12a   :  { %s560_s22 = smov [#allocation11]  }
 0x12b   :  { %s279_s23 = sshll.u32 %s560_s22, 4  ;;  %s280_s23 = int_to_ptr.vmem [resolvable:$true] %s279_s23 }
 0x12c   :  { %s521_s24 = scalar_lea.vmem %s280_s23, 128  ;;  %p526_p12 = scmp.lt.s32.totalorder %s280_s23, %s280_s23 }
 0x12d   :  { %p522_p11 = scmp.ne.s32.totalorder %s280_s23, %s521_s24  ;;  %p527_p13 = scmp.lt.s32.totalorder %s521_s24, %s521_s24 }
 0x12f   :  { %p528_p0 = por %p527_p13, %p526_p12 }
 0x131   :  { %p529_p1 = pnand %p528_p0, %p522_p11 }
 0x1e7   :  { %v268_v40 = vpop.f32.mrf.mxu1 }
 0x1e8   :  { %v269_v41 = vadd.f32 %v304_v39, %v268_v40 }
 0x1e9   :  { %v408_v42 = vpop.f32.mrf.mxu1 }
 0x1ea   :  { %272 = vst [vmem:[#allocation11] sm:$0xff] %v269_v41 }
 0x1eb   :  { %532 = shalt.err (!%p529_p1)
}
 0x1ec   :  { %282 = dma.vmem_to_hbm [thread:$0]  %s280_s23, 128, %s656_s5, [#allocation5]  }
 0x1ed   :  { %547 = dma.done.wait [#allocation5], 128  }
 0x1ee   :  { %548 = vsyncadd [#allocation5], 4294967168 }
 0x1ef   :  { %549 = dma.done.wait [#allocation13], 128  }
 0x1f0   :  { %550 = vsyncadd [#allocation13], 4294967168 }
 0x1f1   :  { %299 = vsyncpa [#allocation4], 1 }
 0x1f2   :  { %300 = vsyncpa [#allocation7], 1 }
 0x1f3   :  { %301 = vsyncpa [#allocation10], 1 }
 0x1f4   :  { %302 = vsyncpa [#allocation5], 1 }
 0x1f5   :  { %303 = vsyncpa [#allocation13], 1 }

</bundles_post_ra>
